<compile_context>
chip_gen: v7x
topology: tpu7x:2x2x1
jax: 0.10.0
libtpu: 0.0.40
codegen_flags: <defaults>
</compile_context>

<pallas_src>
import jax
import jax.numpy as jnp
from jax.experimental import pallas as pl
from jax.experimental.pallas import tpu as pltpu


def _cdiv(a, b):
    return -(-a // b)


def _round_up(v, m):
    return _cdiv(v, m) * m


def _make_graph_conv_kernel(n, tk):
    """Kernel body: out[i-tile] = bias + sum_k A[i,k] @ XW[k]."""
    ragged_k = (n % tk) != 0
    rem = n % tk

    def kernel(a_ref, xw_ref, b_ref, o_ref):
        k = pl.program_id(1)

        @pl.when(k == 0)
        def _init():
            # Initialize the resident f32 output block with the broadcast bias
            # (no separate zero-init + finalize bias-add pass).
            o_ref[...] = jnp.broadcast_to(b_ref[...], o_ref.shape)

        if ragged_k:
            last = pl.num_programs(1) - 1

            @pl.when(k != last)
            def _full_tile():
                o_ref[...] += jnp.dot(
                    a_ref[...], xw_ref[...], preferred_element_type=jnp.float32
                )

            @pl.when(k == last)
            def _masked_tile():
                # Last reduction tile is partially out-of-bounds: zero out the
                # invalid A columns AND the invalid XW rows so garbage (even
                # NaNs) in the padding cannot corrupt the accumulator.
                a = a_ref[...]
                xw = xw_ref[...]
                col = jax.lax.broadcasted_iota(jnp.int32, a.shape, 1)
                row = jax.lax.broadcasted_iota(jnp.int32, xw.shape, 0)
                a = jnp.where(col < rem, a, jnp.zeros_like(a))
                xw = jnp.where(row < rem, xw, jnp.zeros_like(xw))
                o_ref[...] += jnp.dot(a, xw, preferred_element_type=jnp.float32)
        else:
            o_ref[...] += jnp.dot(
                a_ref[...], xw_ref[...], preferred_element_type=jnp.float32
            )

    return kernel


def graph_conv(adj, x, w, b, *, tm=1024, tk=1024):
    """GraphConv forward: adj @ (x @ w) + b, as a tiled Pallas TPU kernel."""
    n, f_in = x.shape
    f_out = w.shape[1]
    assert adj.shape == (n, n)
    b = jnp.reshape(b, (1, f_out)).astype(jnp.float32)

    # A is the HBM-bandwidth-dominant operand; stream it in bf16.  Callers
    # should already produce it in bf16 so this cast fuses into A's producer.
    if adj.dtype != jnp.bfloat16:
        adj = adj.astype(jnp.bfloat16)

    # Precompute XW once (tiny (n, f_in) @ (f_in, f_out) XLA matmul) instead of
    # recomputing it per row tile inside the kernel on a 32-wide contraction.
    xw = jnp.dot(
        x.astype(jnp.float32),
        w.astype(jnp.float32),
        precision=jax.lax.Precision.HIGHEST,
    )
    f_out_p = _round_up(f_out, 128)  # lane-dense output (exactly 128 for f_out<=128)
    if f_out_p != f_out:
        xw = jnp.pad(xw, ((0, 0), (0, f_out_p - f_out)))
        b = jnp.pad(b, ((0, 0), (0, f_out_p - f_out)))
    xw = xw.astype(jnp.bfloat16)

    # Tile sizes: sublane-aligned rows, lane-aligned reduction, clamped to the
    # problem size.  Keep >= 2 row tiles so the "parallel" axis can shard
    # across both v7x TensorCores.
    tm = min(tm, _round_up(n, 8))
    tk = min(tk, _round_up(n, 128))
    if n > 8 and _cdiv(n, tm) < 2:
        tm = _round_up(_cdiv(n, 2), 8)
    grid = (_cdiv(n, tm), _cdiv(n, tk))

    # Scoped VMEM: actual footprint (double-buffered A/XW + resident out) with
    # headroom, well under v7x's 64 MiB per-core budget.
    vmem_bytes = (
        2 * tm * tk * 2          # A: double-buffered bf16
        + 2 * tk * f_out_p * 2   # XW: double-buffered bf16
        + 2 * tm * f_out_p * 4   # output block (resident f32) + writeback
        + 2 * f_out_p * 4        # bias
    )
    vmem_limit = min(64 * 1024 * 1024, max(2 * vmem_bytes, 16 * 1024 * 1024))

    flops = 2 * n * n * f_out_p
    bytes_accessed = (
        n * n * 2                      # A in bf16 (dominant traffic)
        + grid[0] * n * f_out_p * 2    # XW re-streamed once per row tile
        + n * f_out_p * 4              # output
        + f_out_p * 4                  # bias
    )

    out = pl.pallas_call(
        _make_graph_conv_kernel(n, tk),
        out_shape=jax.ShapeDtypeStruct((n, f_out_p), jnp.float32),
        grid=grid,
        in_specs=[
            pl.BlockSpec((tm, tk), lambda i, k: (i, k)),         # A (bf16, streamed)
            pl.BlockSpec((tk, f_out_p), lambda i, k: (k, 0)),    # XW (bf16, streamed)
            pl.BlockSpec((1, f_out_p), lambda i, k: (0, 0)),     # bias (resident)
        ],
        out_specs=pl.BlockSpec((tm, f_out_p), lambda i, k: (i, 0)),
        compiler_params=pltpu.CompilerParams(
            dimension_semantics=("parallel", "arbitrary"),
            vmem_limit_bytes=vmem_limit,
        ),
        cost_estimate=pl.CostEstimate(
            flops=flops, transcendentals=0, bytes_accessed=bytes_accessed
        ),
    )(adj, xw, b)

    return out[:, :f_out] if f_out_p != f_out else out


class IRSModel:
    """JAX/Pallas port of the (stub) PyTorch IRSModel."""

    def __init__(self, name="irs", f_in=32, f_out=32, seed=0):
        self.name = name
        key_w, _ = jax.random.split(jax.random.PRNGKey(seed))
        self.gc_weight = (
            jax.random.normal(key_w, (f_in, f_out), dtype=jnp.float32) * 0.02
        )
        self.gc_bias = jnp.zeros((1, f_out), dtype=jnp.float32)

    def graph_conv(self, adj, x, **tile_kwargs):
        return graph_conv(adj, x, self.gc_weight, self.gc_bias, **tile_kwargs)

    def forward(self, inputs):
        # TODO(synk): reference forward() is an unimplemented stub returning None.
        return None

    def recommend(self, inputs):
        # TODO(synk): reference recommend() is an unimplemented stub returning None.
        return None


if __name__ == "__main__":
    key = jax.random.PRNGKey(0)
    f_in, f_out = 32, 32
    model = IRSModel(f_in=f_in, f_out=f_out, seed=0)

    def make_graph(n, subkey):
        k_adj, k_x = jax.random.split(subkey)
        adj = (jax.random.uniform(k_adj, (n, n)) > 0.8).astype(jnp.float32)
        # Symmetrize + self loops, row-normalize (typical GraphConv preprocessing),
        # then cast to bf16 at the producer (no padded copy in the kernel wrapper).
        adj = jnp.minimum(adj + adj.T + jnp.eye(n, dtype=jnp.float32), 1.0)
        adj = adj / jnp.sum(adj, axis=-1, keepdims=True)
        x = jax.random.normal(k_x, (n, f_in), dtype=jnp.float32)
        return adj.astype(jnp.bfloat16), x

    def reference(adj_bf, x, w, b):
        # Matches the kernel's numerics: XW computed in f32, cast to bf16,
        # A streamed in bf16, f32 accumulation, f32 bias.
        xw_bf = jnp.dot(x, w, precision=jax.lax.Precision.HIGHEST).astype(jnp.bfloat16)
        return (
            jnp.dot(
                adj_bf.astype(jnp.float32),
                xw_bf.astype(jnp.float32),
                precision=jax.lax.Precision.HIGHEST,
            )
            + b
        )

    cases = [
        (256, dict(tm=128, tk=128)),  # aligned 2x2 grid (multi row-tile + k-reduction)
        (320, dict(tm=128, tk=128)),  # ragged N -> exercises in-kernel masking path
        (256, {}),                    # default (clamped) tiles, single k step
    ]
    for idx, (n, tiles) in enumerate(cases):
        adj_bf, x = make_graph(n, jax.random.fold_in(key, idx))
        out = model.graph_conv(adj_bf, x, **tiles)
        out = jax.block_until_ready(out)
        assert out.shape == (n, f_out)

        ref = reference(adj_bf, x, model.gc_weight, model.gc_bias)
        max_err = float(jnp.max(jnp.abs(out - ref)))
        assert jnp.allclose(out, ref, atol=2e-3, rtol=2e-3), (n, tiles, max_err)

        # Loose sanity check against pure-f32 math.
        ref_f32 = adj_bf.astype(jnp.float32) @ (x @ model.gc_weight) + model.gc_bias
        assert jnp.allclose(out, ref_f32, atol=1e-2, rtol=1e-1), (n, tiles)

    # Mirror the stub forward/recommend semantics of the reference module.
    assert model.forward({"adj": adj_bf, "x": x}) is None
    assert model.recommend({"adj": adj_bf, "x": x}) is None

    print("KERNEL_OK")
</pallas_src>

<mosaic_0001>
module attributes {stable_mosaic.version = 11 : i64} {
  func.func @kernel(%arg0: i32, %arg1: i32, %arg2: memref<128x128xbf16, #tpu.memory_space<vmem>>, %arg3: memref<128x128xbf16, #tpu.memory_space<vmem>>, %arg4: memref<1x128xf32, #tpu.memory_space<vmem>>, %arg5: memref<128x128xf32, #tpu.memory_space<vmem>>) attributes {dimension_semantics = [#tpu.dimension_semantics<parallel>, #tpu.dimension_semantics<arbitrary>], iteration_bounds = array<i64: 2, 2>, scalar_prefetch = 0 : i64, scratch_operands = 0 : i64, tpu.core_type = #tpu.core_type<tc>, window_params = [{transform_indices = @transform_0, window_bounds = array<i64: 128, 128>}, {transform_indices = @transform_1, window_bounds = array<i64: 128, 128>}, {pipeline_mode = #tpu.pipeline_mode<synchronous>, transform_indices = @transform_2, window_bounds = array<i64: 1, 128>}, {transform_indices = @transform_3, window_bounds = array<i64: 128, 128>}]} {
    %c0_i32 = arith.constant 0 : i32
    %0 = arith.cmpi eq, %arg1, %c0_i32 : i32
    %1 = arith.extui %0 : i1 to i32
    %c0_i32_0 = arith.constant 0 : i32
    %2 = arith.cmpi ne, %1, %c0_i32_0 : i32
    scf.if %2 {
      %c0_8 = arith.constant 0 : index
      %c0_9 = arith.constant 0 : index
      %9 = vector.load %arg4[%c0_8, %c0_9] : memref<1x128xf32, #tpu.memory_space<vmem>>, vector<1x128xf32>
      %10 = vector.shape_cast %9 : vector<1x128xf32> to vector<1x128xf32>
      %11 = vector.broadcast %10 : vector<1x128xf32> to vector<128x128xf32>
      %c0_10 = arith.constant 0 : index
      %c0_11 = arith.constant 0 : index
      %12 = vector.load %arg5[%c0_10, %c0_11] : memref<128x128xf32, #tpu.memory_space<vmem>>, vector<128x128xf32>
      tpu.vector_store %arg5[%c0_10, %c0_11], %11 {strides = array<i32>} : memref<128x128xf32, #tpu.memory_space<vmem>>, vector<128x128xf32>,
    } else {
    }
    %c0 = arith.constant 0 : index
    %c0_1 = arith.constant 0 : index
    %3 = vector.load %arg5[%c0, %c0_1] : memref<128x128xf32, #tpu.memory_space<vmem>>, vector<128x128xf32>
    %c0_2 = arith.constant 0 : index
    %c0_3 = arith.constant 0 : index
    %4 = vector.load %arg2[%c0_2, %c0_3] : memref<128x128xbf16, #tpu.memory_space<vmem>>, vector<128x128xbf16>
    %c0_4 = arith.constant 0 : index
    %c0_5 = arith.constant 0 : index
    %5 = vector.load %arg3[%c0_4, %c0_5] : memref<128x128xbf16, #tpu.memory_space<vmem>>, vector<128x128xbf16>
    %cst = arith.constant dense<0.000000e+00> : vector<128x128xf32>
    %6 = tpu.matmul %4, %5, %cst {dimension_numbers = #tpu.dot_dimension_numbers<[1], [0], [0], [1], [0, 0, 1, 1], [], []>} : vector<128x128xbf16>, vector<128x128xbf16>, vector<128x128xf32> -> vector<128x128xf32>
    %7 = arith.addf %3, %6 : vector<128x128xf32>
    %c0_6 = arith.constant 0 : index
    %c0_7 = arith.constant 0 : index
    %8 = vector.load %arg5[%c0_6, %c0_7] : memref<128x128xf32, #tpu.memory_space<vmem>>, vector<128x128xf32>
    tpu.vector_store %arg5[%c0_6, %c0_7], %7 {strides = array<i32>} : memref<128x128xf32, #tpu.memory_space<vmem>>, vector<128x128xf32>,
    return
  }
  func.func @transform_0(%arg0: i32, %arg1: i32) -> (i32, i32) {
    %c0_i32 = arith.constant 0 : i32
    return %arg0, %arg1 : i32, i32
  }
  func.func @transform_1(%arg0: i32, %arg1: i32) -> (i32, i32) {
    %c0_i32 = arith.constant 0 : i32
    %c0_i32_0 = arith.constant 0 : i32
    return %arg1, %c0_i32 : i32, i32
  }
  func.func @transform_2(%arg0: i32, %arg1: i32) -> (i32, i32) {
    %c0_i32 = arith.constant 0 : i32
    %c0_i32_0 = arith.constant 0 : i32
    %c0_i32_1 = arith.constant 0 : i32
    return %c0_i32, %c0_i32_0 : i32, i32
  }
  func.func @transform_3(%arg0: i32, %arg1: i32) -> (i32, i32) {
    %c0_i32 = arith.constant 0 : i32
    %c0_i32_0 = arith.constant 0 : i32
    return %arg0, %c0_i32 : i32, i32
  }
}

</mosaic_0001>

<bundles_post_ra>
// kernel: tpu_custom_call.1
= control target key start
LH: loop header
LB: loop body
LE: loop exit
PB: predicated region body
PF: predicated region fallthrough
CT: control target
= control target key end

     0   :  { %s1589_s0 = inlined_call_operand.hbm [shape: bf16[256,256], index: 0, kind: input, shape index: {}]   ;;  %s1590_s1 = inlined_call_operand.hbm [shape: bf16[256,128], index: 1, kind: input, shape index: {}]   ;;  %s1591_s2 = inlined_call_operand.vmem [shape: f32[1,128], index: 2, kind: input, shape index: {}]   ;;  %s1592_s3 = inlined_call_operand.hbm [shape: f32[256,128], index: 3, kind: output, shape index: {}]  }
   0x1   :  { %1604 = sst [smem:[#allocation16_spill]] %s1589_s0 }
   0x2   :  { %1605 = sst [smem:[#allocation17_spill]] %s1590_s1 }
   0x3   :  { %1606 = sst [smem:[#allocation18_spill]] %s1591_s2 }
   0x4   :  { %1607 = sst [smem:[#allocation19_spill]] %s1592_s3 }
   0x5   :  { %8 = vsyncpa [#allocation3], 0 }
   0x6   :  { %10 = vsyncpa [#allocation3 + $0x1], 0 }
   0x7   :  { %11 = vsyncpa [#allocation6], 0 }
   0x8   :  { %13 = vsyncpa [#allocation6 + $0x1], 0 }
   0x9   :  { %14 = vsyncpa [#allocation4], 0 }
   0xa   :  { %16 = vsyncpa [#allocation4 + $0x1], 0  ;;  %s1169_s12 = smov 0   ;;  %s1171_s13 = smov 0  }
   0xb   :  { %s1173_s14 = smov 0   ;;  %s1175_s15 = smov 0  }
   0xc   :  { %s1177_s16 = smov 0   ;;  %s1179_s17 = smov 0  }
   0xd   :  { %s1181_s18 = smov 0   ;;  %s1183_s19 = smov 0  }
   0xe   :  { %s1185_s20 = smov 0   ;;  %s1187_s21 = smov 0  }
   0xf   :  { %s1189_s22 = smov 0   ;;  %s1191_s23 = smov 0  }
  0x10   :  { %s1193_s24 = smov 0   ;;  %s1195_s25 = smov 0  }
  0x11 LB: > { %1608 = sst [smem:[#allocation11_spill]] %s1087_s12  ;;  %s31_s26 = sadd.s32 1, %s1131_s23  ;;  %s1139_s25 = sphi %s1195_s25, %s22_s25   ;;  %s1135_s24 = sphi %s1193_s24, %s1655_s24   ;;  %s1131_s23 = sphi %s1191_s23, %s1654_s23   ;;  %s1127_s22 = sphi %s1189_s22, %s1653_s22   ;;  %s1123_s21 = sphi %s1187_s21, %s1652_s21   ;;  %s1119_s20 = sphi %s1185_s20, %s1651_s20   ;;  %s1115_s19 = sphi %s1183_s19, %s1650_s19   ;;  %s1111_s18 = sphi %s1181_s18, %s1649_s18   ;;  %s1107_s17 = sphi %s1179_s17, %s1648_s17   ;;  %s1103_s16 = sphi %s1177_s16, %s1647_s16   ;;  %s1099_s15 = sphi %s1175_s15, %s1646_s15   ;;  %s1095_s14 = sphi %s1173_s14, %s1645_s14   ;;  %s1091_s13 = sphi %s1171_s13, %s1644_s13   ;;  %s1087_s12 = sphi %s1169_s12, %s1643_s12  }
  0x12   : > { %1609 = sst [smem:[#allocation12_spill]] %s1123_s21  ;;  %s34_s27 = sadd.s32 1, %s1135_s24 }
  0x13   : > { %1610 = sst [smem:[#allocation13_spill]] %s1127_s22  ;;  %p32_p0 = scmp.ge.s32.totalorder %s31_s26, 2 }
  0x14   : > { %s43_s28 = sadd.s32 1, %s1119_s20  ;;  %p50_p1 = scmp.ne.s32.totalorder %s1119_s20, %s1115_s19 }
  0x15   : > { %p1597_p2 = scmp.eq.s32.totalorder %s1139_s25, 0  ;;  %s1657_s26 = smov (%p32_p0, %s31_s26), 0 }
  0x16   : > { %1611 = sst [smem:[#allocation14_spill]] %s1657_s26  ;;  %s1659_s27 = smov (!%p32_p0, %s34_s27), %s1135_s24 }
  0x17   : > { %s1250_s29 = ssub.s32 %s1131_s23, %s1657_s26  ;;  %p1254_p3 = por %p1597_p2, %p50_p1 }
  0x18   : > { %p36_p4 = scmp.ge.s32.totalorder %s1659_s27, 2  ;;  %s116_s4 = sadd.s32 1, %s1095_s14 }
  0x19   : > { %p1596_p7 = scmp.lt.s32.totalorder %s1139_s25, 4  ;;  %s156_s6 = sand.u32 1, %s1119_s20  }
  0x1a   : > { %s1661_s27 = smov (%p36_p4, %s1659_s27), 0  ;;  %s676_s10 = sshll.u32 %s156_s6, 6 }
  0x1b   : > { %1613 = sst [smem:[#allocation15_spill]] %s1661_s27  ;;  %s38_s5 = ssub.s32 %s1135_s24, %s1661_s27 }
  0x1c   : > { %s40_s7 = sor.u32 %s1250_s29, %s38_s5  ;;  %p114_p8 = scmp.eq.s32.totalorder %s38_s5, 0 }
  0x1d   : > { %p41_p9 = scmp.eq.s32.totalorder %s40_s7, 0  ;;  %s710_s11 = sshll.u32 %s1135_s24, 5 }
  0x1e   : > { %s1270_s8 = scalar_select %p114_p8, %s1095_s14, %s116_s4  }
  0x1f   : > { %s1273_s9 = scalar_select %p41_p9, %s1119_s20, %s43_s28  }
  0x20   : > { %s166_s26 = sadd.s32 %s1131_s23, %s710_s11  ;;  %s160_s22 = scalar_lea.vmem [#allocation2], %s676_s10 }
  0x21   : > { %s679_s3 = sshll.u32 %s166_s26, 6  ;;  %s169_s2 = sshll.u32 %s160_s22, 4  ;;  %s1282_s2 = int_to_ptr.vmem [resolvable:$true] %s169_s2 }
  0x22   : > { %s1614_s0 = sld [smem:[#allocation16_spill]]  ;;  %p1288_p10 = pnand %p1596_p7, %p1254_p3 }
  0x23   : > { %p683_p11 = scmp.ge.s32.totalorder %s1139_s25, 1  ;;  %s1293_s22 = scalar_lea.sflag [#allocation3], %s156_s6 }
  0x24   : > { %p931_p13 = pneg %p1288_p10 }
  0x28   : > { %s1280_s12 = scalar_lea.hbm %s1614_s0, %s679_s3  ;;  %s934_s26 = scalar_lea.hbm %s1614_s0, 4096 }
  0x29   : > { %s929_s1 = scalar_lea.hbm %s1280_s12, 1024  ;;  %p935_p3 = scmp.lt.u32.totalorder %s1280_s12, %s1614_s0 }
  0x2a   : > { %p930_p12 = scmp.ne.s32.totalorder %s1280_s12, %s929_s1  ;;  %p936_p4 = scmp.lt.u32.totalorder %s934_s26, %s929_s1 }
  0x2b   : > { %p938_p9 = scmp.lt.u32.totalorder %s929_s1, %s1280_s12 }
  0x2c   : > { %p932_p0 = pnand %p931_p13, %p930_p12  ;;  %p937_p8 = por %p936_p4, %p935_p3 }
  0x2e   : > { %p933_p1 = pneg %p932_p0  ;;  %p939_p7 = por %p938_p9, %p937_p8 }
  0x30   : > { %p940_p2 = pnand %p939_p7, %p933_p1 }
  0x32   : > { %943 = shalt.err (!%p940_p2)
}
  0x33   : > { %s944_s5 = scalar_lea.vmem %s1282_s2, 1024  ;;  %s1141_s6 = smov [#allocation2]  }
  0x34   : > { %p945_p12 = scmp.ne.s32.totalorder %s1282_s2, %s944_s5  ;;  %s949_s7 = sshll.u32 %s1141_s6, 4  ;;  %s950_s7 = int_to_ptr.vmem [resolvable:$false] %s949_s7 }
  0x35   : > { %s951_s10 = scalar_lea.vmem %s950_s7, 2048  ;;  %p952_p6 = scmp.lt.s32.totalorder %s1282_s2, %s950_s7 }
  0x36   : > { %p947_p0 = pnand %p945_p12, %p931_p13  ;;  %p953_p3 = scmp.lt.s32.totalorder %s951_s10, %s944_s5 }
  0x38   : > { %p948_p5 = pneg %p947_p0  ;;  %p954_p4 = por %p953_p3, %p952_p6 }
  0x3a   : > { %p955_p8 = pnand %p954_p4, %p948_p5 }
  0x3c   : > { %958 = shalt.err (!%p955_p8)
}
  0x3d   : > { %s1142_s11 = smov 128   ;;  %s1598_s1 = smov 64  }
  0x3e   : > { %s1599_s3 = smov 4   ;;  %s1616_s21 = sld [smem:[#allocation11_spill]] }
  0x3f   : > { %786 = dma.hbm_to_vmem [thread:$0]  (!%p1288_p10), %s1280_s12, 1024, %s1282_s2, %s1293_s22, %s1142_s11, %s1598_s1, %s1599_s3  }
  0x40   : > { %p198_p2 = scmp.lt.s32.totalorder %s1139_s25, 5  ;;  %s672_s30 = sadd.s32 4294967295, %s1139_s25  }
  0x41   : > { %s673_s4 = sadd.s32 4294967294, %s1139_s25   ;;  %p57_p6 = scmp.eq.s32.totalorder %s672_s30, 0 }
  0x42   : > { %p1326_p5 = pnand %p683_p11, %p198_p2  ;;  %s69_s5 = sadd.s32 1, %s1107_s17 }
  0x43   : > { %p1618_p7 = scmp.eq.s32.totalorder %s1250_s29, 0  ;;  %p1619_p13 = scmp.ne.s32.totalorder %s1115_s19, %s1111_s18 }
  0x44   : > { %p76_p10 = scmp.ne.s32.totalorder %s1107_s17, %s1103_s16  ;;  %p82_p11 = scmp.ne.s32.totalorder %s1103_s16, %s1099_s15 }
  0x45   : > { %s1336_s6 = scalar_select %p1618_p7, %s1107_s17, %s69_s5  }
  0x46   : > { %p1341_p1 = por %p57_p6, %p1619_p13  ;;  %p126_p9 = scmp.ne.s32.totalorder %s1095_s14, %s1091_s13 }
  0x47   : > { %p1621_p12 = scmp.eq.s32.totalorder %s1139_s25, 0  ;;  %p127_p3 = scmp.eq.s32.totalorder %s672_s30, 3 }
  0x48   : > { %s1620_s28 = scalar_select %p1341_p1, 1, 0 }
  0x49   : > { %p78_p0 = por %p76_p10, %p1621_p12  ;;  %p1353_p4 = por %p82_p11, %p57_p6 }
  0x4a   : > { %p132_p8 = scmp.ne.s32.totalorder %s1091_s13, %s1616_s21  ;;  %p1359_p2 = por %p127_p3, %p126_p9 }
  0x4b   : > { %s1622_s2 = scalar_select %p1353_p4, 1, 0 }
  0x4c   : > { %s1623_s12 = scalar_select %p1359_p2, 1, 0 }
  0x4d   : > { %p133_p7 = scmp.eq.s32.totalorder %s673_s4, 3  ;;  %s179_s18 = sand.u32 1, %s1107_s17  }
  0x4e   : > { %s711_s29 = sshll.u32 %s1131_s23, 10  ;;  %s680_s15 = sshll.u32 %s179_s18, 6 }
  0x4f   : > { %p1365_p13 = por %p133_p7, %p132_p8  ;;  %s1625_s11 = sld [smem:[#allocation17_spill]] }
  0x50   : > { %p1626_p6 = scmp.lt.s32.totalorder %s1139_s25, 4  ;;  %s183_s4 = scalar_lea.vmem [#allocation5], %s680_s15 }
  0x51   : > { %s1624_s22 = scalar_select %p1365_p13, 1, 0 }
  0x52   : > { %p1376_p10 = pnand %p1626_p6, %p78_p0  ;;  %s190_s5 = sshll.u32 %s183_s4, 4  ;;  %s1380_s5 = int_to_ptr.vmem [resolvable:$true] %s190_s5 }
  0x53   : > { %s1382_s1 = scalar_lea.sflag [#allocation6], %s179_s18 }
  0x54   : > { %p961_p9 = pneg %p1376_p10 }
  0x55   : > { %s1372_s30 = scalar_lea.hbm %s1625_s11, %s711_s29  ;;  %s964_s3 = scalar_lea.hbm %s1625_s11, 2048 }
  0x56   : > { %s959_s7 = scalar_lea.hbm %s1372_s30, 1024  ;;  %p965_p0 = scmp.lt.u32.totalorder %s1372_s30, %s1625_s11 }
  0x57   : > { %p960_p11 = scmp.ne.s32.totalorder %s1372_s30, %s959_s7  ;;  %p966_p8 = scmp.lt.u32.totalorder %s964_s3, %s959_s7 }
  0x58   : > { %p968_p6 = scmp.lt.u32.totalorder %s959_s7, %s1372_s30 }
  0x59   : > { %p962_p12 = pnand %p961_p9, %p960_p11  ;;  %p967_p7 = por %p966_p8, %p965_p0 }
  0x5b   : > { %p963_p3 = pneg %p962_p12  ;;  %p969_p13 = por %p968_p6, %p967_p7 }
  0x5d   : > { %p970_p2 = pnand %p969_p13, %p963_p3 }
  0x5f   : > { %973 = shalt.err (!%p970_p2)
}
  0x60   : > { %s974_s18 = scalar_lea.vmem %s1380_s5, 1024  ;;  %s1145_s15 = smov [#allocation5]  }
  0x61   : > { %p975_p11 = scmp.ne.s32.totalorder %s1380_s5, %s974_s18  ;;  %s979_s4 = sshll.u32 %s1145_s15, 4  ;;  %s980_s4 = int_to_ptr.vmem [resolvable:$false] %s979_s4 }
  0x62   : > { %s981_s0 = scalar_lea.vmem %s980_s4, 2048  ;;  %p982_p1 = scmp.lt.s32.totalorder %s1380_s5, %s980_s4 }
  0x63   : > { %p977_p12 = pnand %p975_p11, %p961_p9  ;;  %p983_p0 = scmp.lt.s32.totalorder %s981_s0, %s974_s18 }
  0x65   : > { %p978_p4 = pneg %p977_p12  ;;  %p984_p8 = por %p983_p0, %p982_p1 }
  0x67   : > { %p985_p7 = pnand %p984_p8, %p978_p4 }
  0x69   : > { %988 = shalt.err (!%p985_p7)
}
  0x6a   : > { %s1628_s27 = smov 4   ;;  %s1629_s3 = smov 64  }
  0x6b   : > { %789 = dma.hbm_to_vmem [thread:$0]  (!%p1376_p10), %s1372_s30, 1024, %s1380_s5, %s1382_s1, %s1629_s3, %s1629_s3, %s1628_s27  }
  0x6c   : > { %202 = sbr.rel (%p1326_p5) target bundleno = 415 (0x19f), region = 32  ;;  %s204_s7 = sand.u32 (!%p1326_p5), 1, %s1115_s19  }
  0x6d   : > { %s684_s29 = sshll.u32 (!%p1326_p5), %s204_s7, 6  ;;  %s205_s10 = scalar_lea.sflag (!%p1326_p5), [#allocation3], %s204_s7 }
  0x6e   : > { %s1416_s18 = scalar_lea.vmem (!%p1326_p5), [#allocation2], %s684_s29  ;;  %p1630_p1 = scmp.ne.s32.totalorder (!%p1326_p5), %s1620_s28, 0 }
  0x73   : > { %1074 = dma.done.wait (%p1630_p1), %s205_s10, 1024  }
  0x74   : > { %1076 = vsyncadd (%p1630_p1), %s205_s10, 4294966272  ;;  %s213_s21 = sand.u32 1, %s1103_s16   ;;  %p1631_p5 = scmp.ne.s32.totalorder %s1622_s2, 0 }
  0x75   : > { %s685_s15 = sshll.u32 %s213_s21, 6  ;;  %s214_s1 = scalar_lea.sflag [#allocation6], %s213_s21 }
  0x76   : > { %s1423_s30 = scalar_lea.vmem [#allocation5], %s685_s15 }
  0x77   : > { %1078 = dma.done.wait (%p1631_p5), %s214_s1, 1024  }
  0x78   : > { %1080 = vsyncadd (%p1631_p5), %s214_s1, 4294966272  ;;  %s242_s26 = sand.u32 1, %s1091_s13   ;;  %s1632_s28 = sld [smem:[#allocation12_spill]] }
  0x79   : > { %s686_s5 = sshll.u32 %s242_s26, 7 }
  0x7a   : > { %s1432_s4 = scalar_lea.vmem [#allocation7], %s686_s5 }
  0x7e   : > { %p687_p4 = scmp.ne.s32.totalorder %s1632_s28, 0 }
  0x7f   : > { %s1633_s3 = sld [smem:[#allocation18_spill]] (!%p687_p4) }
  0x80   : > { %252 = sbr.rel (%p687_p4) target bundleno = 142 (0x8e), region = 44 }
  0x85   : > { %v688_v0 = vld [vmem:[%s1633_s3] ss:$0 sm:$0xff] (!%p687_p4) }
  0x86   : > { %260 = vst [vmem:[%s1432_s4] sm:$0xff] (!%p687_p4), %v688_v0  ;;  %261 = vst [vmem:[%s1432_s4 + $0x8] sm:$0xff] (!%p687_p4), %v688_v0 }
  0x87   : > { %262 = vst [vmem:[%s1432_s4 + $0x10] sm:$0xff] %v688_v0  ;;  %263 = vst [vmem:[%s1432_s4 + $0x18] sm:$0xff] %v688_v0 }
  0x88   : > { %264 = vst [vmem:[%s1432_s4 + $0x20] sm:$0xff] %v688_v0  ;;  %265 = vst [vmem:[%s1432_s4 + $0x28] sm:$0xff] %v688_v0 }
  0x89   : > { %266 = vst [vmem:[%s1432_s4 + $0x30] sm:$0xff] %v688_v0  ;;  %267 = vst [vmem:[%s1432_s4 + $0x38] sm:$0xff] %v688_v0 }
  0x8a   : > { %268 = vst [vmem:[%s1432_s4 + $0x40] sm:$0xff] %v688_v0  ;;  %269 = vst [vmem:[%s1432_s4 + $0x48] sm:$0xff] %v688_v0 }
  0x8b   : > { %270 = vst [vmem:[%s1432_s4 + $0x50] sm:$0xff] %v688_v0  ;;  %271 = vst [vmem:[%s1432_s4 + $0x58] sm:$0xff] %v688_v0 }
  0x8c   : > { %272 = vst [vmem:[%s1432_s4 + $0x60] sm:$0xff] %v688_v0  ;;  %273 = vst [vmem:[%s1432_s4 + $0x68] sm:$0xff] %v688_v0 }
  0x8d   : > { %274 = vst [vmem:[%s1432_s4 + $0x70] sm:$0xff] %v688_v0  ;;  %275 = vst [vmem:[%s1432_s4 + $0x78] sm:$0xff] %v688_v0 }
  0x8e PF: > { %v913_v1 = vld [vmem:[%s1423_s30] sm:$0xff]   ;;  %v914_v2 = vld [vmem:[%s1423_s30 + $0x8] sm:$0xff]   ;;  %v915_v3 = vld [vmem:[%s1423_s30 + $0x10] sm:$0xff]   ;;  %s1634_s2 = sld [smem:[#allocation13_spill]]  ;;  %s563_s29 = sshll.u32 %s1432_s4, 4  ;;  %s1503_s29 = int_to_ptr.vmem [resolvable:$true] %s563_s29 }
  0x8f   : > { %729 = vmatprep.subr.bf16.mxu0 %v913_v1  ;;  %761 = vmatprep.subr.bf16.mxu1 %v913_v1  ;;  %v916_v4 = vld [vmem:[%s1423_s30 + $0x18] sm:$0xff]   ;;  %v921_v5 = vld [vmem:[%s1416_s18] sm:$0xff]   ;;  %v918_v8 = vld [vmem:[%s1423_s30 + $0x28] sm:$0xff]   ;;  %s1635_s21 = sld [smem:[#allocation19_spill]]  ;;  %s989_s5 = scalar_lea.vmem %s1503_s29, 2048 }
  0x90   : > { %730 = vmatpush3.bf16.msra.mxu0 %v913_v1  ;;  %769 = vmatpush3.bf16.msra.mxu1 %v913_v1  ;;  %v922_v6 = vld [vmem:[%s1416_s18 + $0x20] sm:$0xff]   ;;  %v919_v9 = vld [vmem:[%s1423_s30 + $0x30] sm:$0xff]   ;;  %v920_v10 = vld [vmem:[%s1423_s30 + $0x38] sm:$0xff]   ;;  %p990_p2 = scmp.ne.s32.totalorder %s1503_s29, %s989_s5  ;;  %p1637_p13 = scmp.ne.s32.totalorder %s1623_s12, 0 }
  0x91   : > { %731 = vmatprep.subr.bf16.mxu0 %v914_v2  ;;  %762 = vmatprep.subr.bf16.mxu1 %v914_v2  ;;  %v917_v7 = vld [vmem:[%s1423_s30 + $0x20] sm:$0xff]   ;;  %v923_v11 = vld [vmem:[%s1416_s18 + $0x8] sm:$0xff]   ;;  %v925_v13 = vld [vmem:[%s1416_s18 + $0x10] sm:$0xff]   ;;  %s1513_s30 = scalar_lea.sflag [#allocation4], %s242_s26  ;;  %s1146_s28 = smov [#allocation7]  }
  0x92   : > { %745 = vmatprep.mubr.bf16.mxu0 %v921_v5  ;;  %753 = vmatprep.mubr.bf16.mxu1 %v922_v6  ;;  %v924_v12 = vld [vmem:[%s1416_s18 + $0x28] sm:$0xff]   ;;  %v926_v14 = vld [vmem:[%s1416_s18 + $0x30] sm:$0xff]   ;;  %v927_v15 = vld [vmem:[%s1416_s18 + $0x18] sm:$0xff]   ;;  %p991_p10 = pnand %p990_p2, %p1637_p13  ;;  %s993_s0 = sshll.u32 %s1146_s28, 4  ;;  %s994_s0 = int_to_ptr.vmem [resolvable:$false] %s993_s0 }
  0x93   : > { %v928_v16 = vld [vmem:[%s1416_s18 + $0x38] sm:$0xff]   ;;  %v286_v18 = vld [vmem:[%s1432_s4 + $0x50] sm:$0xff]  ;;  %v284_v20 = vld [vmem:[%s1432_s4 + $0x40] sm:$0xff]  ;;  %s995_s27 = scalar_lea.vmem %s994_s0, 4096  ;;  %p996_p3 = scmp.lt.s32.totalorder %s1503_s29, %s994_s0 }
  0x94   : > { %732 = vmatpush3.bf16.msra.mxu0 %v914_v2  ;;  %770 = vmatpush3.bf16.msra.mxu1 %v914_v2  ;;  %v276_v19 = vld [vmem:[%s1432_s4] sm:$0xff]  ;;  %v279_v23 = vld [vmem:[%s1432_s4 + $0x18] sm:$0xff]  ;;  %v277_v29 = vld [vmem:[%s1432_s4 + $0x8] sm:$0xff]  ;;  %s712_s7 = sshll.u32 %s1634_s2, 11  ;;  %p992_p9 = pneg %p991_p10 }
  0x95   : > { %733 = vmatprep.subr.bf16.mxu0 %v915_v3  ;;  %763 = vmatprep.subr.bf16.mxu1 %v915_v3  ;;  %v278_v17 = vld [vmem:[%s1432_s4 + $0x10] sm:$0xff]  ;;  %v287_v24 = vld [vmem:[%s1432_s4 + $0x58] sm:$0xff]  ;;  %v285_v30 = vld [vmem:[%s1432_s4 + $0x48] sm:$0xff]  ;;  %s1636_s1 = smov %s1635_s21  ;;  %s1501_s15 = scalar_lea.hbm %s1635_s21, %s712_s7 }
  0x96   : > { %v282_v41 = vld [vmem:[%s1432_s4 + $0x30] sm:$0xff]  ;;  %v280_v43 = vld [vmem:[%s1432_s4 + $0x20] sm:$0xff]  ;;  %v283_v47 = vld [vmem:[%s1432_s4 + $0x38] sm:$0xff]  ;;  %p997_p6 = scmp.lt.s32.totalorder %s995_s27, %s989_s5 }
  0x97   : > { %v290_v42 = vld [vmem:[%s1432_s4 + $0x70] sm:$0xff]  ;;  %v288_v44 = vld [vmem:[%s1432_s4 + $0x60] sm:$0xff]  ;;  %v291_v48 = vld [vmem:[%s1432_s4 + $0x78] sm:$0xff] }
  0x98   : > { %734 = vmatpush3.bf16.msra.mxu0 %v915_v3  ;;  %771 = vmatpush3.bf16.msra.mxu1 %v915_v3  ;;  %v281_v53 = vld [vmem:[%s1432_s4 + $0x28] sm:$0xff]  ;;  %p998_p11 = por %p997_p6, %p996_p3 }
  0x99   : > { %735 = vmatprep.subr.bf16.mxu0 %v916_v4  ;;  %764 = vmatprep.subr.bf16.mxu1 %v916_v4  ;;  %v289_v54 = vld [vmem:[%s1432_s4 + $0x68] sm:$0xff] }
  0x9a   : > { %p999_p12 = pnand %p998_p11, %p992_p9 }
  0x9c   : > { %736 = vmatpush3.bf16.msra.mxu0 %v916_v4  ;;  %772 = vmatpush3.bf16.msra.mxu1 %v916_v4 }
  0x9d   : > { %737 = vmatprep.subr.bf16.mxu0 %v917_v7  ;;  %765 = vmatprep.subr.bf16.mxu1 %v917_v7 }
  0xa0   : > { %738 = vmatpush3.bf16.msra.mxu0 %v917_v7  ;;  %773 = vmatpush3.bf16.msra.mxu1 %v917_v7 }
  0xa1   : > { %739 = vmatprep.subr.bf16.mxu0 %v918_v8  ;;  %766 = vmatprep.subr.bf16.mxu1 %v918_v8 }
  0xa4   : > { %740 = vmatpush3.bf16.msra.mxu0 %v918_v8  ;;  %774 = vmatpush3.bf16.msra.mxu1 %v918_v8 }
  0xa5   : > { %741 = vmatprep.subr.bf16.mxu0 %v919_v9  ;;  %767 = vmatprep.subr.bf16.mxu1 %v919_v9 }
  0xa8   : > { %742 = vmatpush3.bf16.msra.mxu0 %v919_v9  ;;  %775 = vmatpush3.bf16.msra.mxu1 %v919_v9 }
  0xa9   : > { %743 = vmatprep.subr.bf16.mxu0 %v920_v10  ;;  %768 = vmatprep.subr.bf16.mxu1 %v920_v10 }
  0xac   : > { %744 = vmatpush3.bf16.msra.mxu0 %v920_v10  ;;  %776 = vmatpush3.bf16.msra.mxu1 %v920_v10 }
  0xaf   : > { %746 = vmatmul.mubr.bf16.vlgmr.msra.gmra.mrb[0].mxu0 %v923_v11  ;;  %754 = vmatmul.mubr.bf16.vlgmr.msra.gmra.mrb[0].mxu1 %v924_v12 }
  0xb0   : > { %749 = vmatprep.mubr.bf16.mxu0 %v925_v13  ;;  %757 = vmatprep.mubr.bf16.mxu1 %v926_v14 }
  0xb7   : > { %750 = vmatmul.mubr.bf16.gmra.mrb[4].mxu0 %v927_v15  ;;  %758 = vmatmul.mubr.bf16.gmra.mrb[4].mxu1 %v928_v16 }
 0x182   : > { %v747_v21 = vpop.f32.mrb[0].mxu0  ;;  %v755_v22 = vpop.f32.mrb[0].mxu1 }
 0x183   : > { %v519_v25 = vadd.f32 %v747_v21, %v278_v17  ;;  %v527_v26 = vadd.f32 %v755_v22, %v286_v18  ;;  %v454_v27 = vpop.f32.mrb[1].mxu0  ;;  %v486_v28 = vpop.f32.mrb[1].mxu1 }
 0x184   : > { %v517_v31 = vadd.f32 %v454_v27, %v276_v19  ;;  %v525_v32 = vadd.f32 %v486_v28, %v284_v20  ;;  %v748_v33 = vpop.f32.mrb[2].mxu0  ;;  %v756_v34 = vpop.f32.mrb[2].mxu1 }
 0x185   : > { %535 = vst [vmem:[%s1432_s4 + $0x10] sm:$0xff] %v519_v25  ;;  %543 = vst [vmem:[%s1432_s4 + $0x50] sm:$0xff] %v527_v26  ;;  %v520_v35 = vadd.f32 %v748_v33, %v279_v23  ;;  %v528_v36 = vadd.f32 %v756_v34, %v287_v24  ;;  %v457_v37 = vpop.f32.mrb[3].mxu0  ;;  %v489_v38 = vpop.f32.mrb[3].mxu1 }
 0x186   : > { %533 = vst [vmem:[%s1432_s4] sm:$0xff] %v517_v31  ;;  %541 = vst [vmem:[%s1432_s4 + $0x40] sm:$0xff] %v525_v32  ;;  %v518_v39 = vadd.f32 %v457_v37, %v277_v29  ;;  %v526_v40 = vadd.f32 %v489_v38, %v285_v30 }
 0x187   : > { %536 = vst [vmem:[%s1432_s4 + $0x18] sm:$0xff] %v520_v35  ;;  %544 = vst [vmem:[%s1432_s4 + $0x58] sm:$0xff] %v528_v36 }
 0x188   : > { %534 = vst [vmem:[%s1432_s4 + $0x8] sm:$0xff] %v518_v39  ;;  %542 = vst [vmem:[%s1432_s4 + $0x48] sm:$0xff] %v526_v40 }
 0x18a   : > { %v751_v45 = vpop.f32.mrb[4].mxu0  ;;  %v759_v46 = vpop.f32.mrb[4].mxu1 }
 0x18b   : > { %v523_v49 = vadd.f32 %v751_v45, %v282_v41  ;;  %v531_v50 = vadd.f32 %v759_v46, %v290_v42  ;;  %v470_v51 = vpop.f32.mrb[5].mxu0  ;;  %v502_v52 = vpop.f32.mrb[5].mxu1 }
 0x18c   : > { %v521_v55 = vadd.f32 %v470_v51, %v280_v43  ;;  %v529_v56 = vadd.f32 %v502_v52, %v288_v44  ;;  %v752_v57 = vpop.f32.mrb[6].mxu0  ;;  %v760_v58 = vpop.f32.mrb[6].mxu1 }
 0x18d   : > { %539 = vst [vmem:[%s1432_s4 + $0x30] sm:$0xff] %v523_v49  ;;  %547 = vst [vmem:[%s1432_s4 + $0x70] sm:$0xff] %v531_v50  ;;  %v524_v59 = vadd.f32 %v752_v57, %v283_v47  ;;  %v532_v60 = vadd.f32 %v760_v58, %v291_v48  ;;  %v473_v61 = vpop.f32.mrb[7].mxu0  ;;  %v505_v62 = vpop.f32.mrb[7].mxu1 }
 0x18e   : > { %537 = vst [vmem:[%s1432_s4 + $0x20] sm:$0xff] %v521_v55  ;;  %545 = vst [vmem:[%s1432_s4 + $0x60] sm:$0xff] %v529_v56  ;;  %v522_v63 = vadd.f32 %v473_v61, %v281_v53  ;;  %v530_v0 = vadd.f32 %v505_v62, %v289_v54 }
 0x18f   : > { %540 = vst [vmem:[%s1432_s4 + $0x38] sm:$0xff] %v524_v59  ;;  %548 = vst [vmem:[%s1432_s4 + $0x78] sm:$0xff] %v532_v60 }
 0x190   : > { %538 = vst [vmem:[%s1432_s4 + $0x28] sm:$0xff] %v522_v63  ;;  %546 = vst [vmem:[%s1432_s4 + $0x68] sm:$0xff] %v530_v0 }
 0x191   : > { %1002 = shalt.err (!%p999_p12)
}
 0x192   : > { %s1003_s26 = scalar_lea.hbm %s1501_s15, 2048  ;;  %s1007_s2 = scalar_lea.hbm %s1636_s1, 4096 }
 0x193   : > { %p1004_p0 = scmp.ne.s32.totalorder %s1501_s15, %s1003_s26  ;;  %p1008_p1 = scmp.lt.u32.totalorder %s1501_s15, %s1636_s1 }
 0x194   : > { %p1009_p5 = scmp.lt.u32.totalorder %s1007_s2, %s1003_s26  ;;  %p1011_p2 = scmp.lt.u32.totalorder %s1003_s26, %s1501_s15 }
 0x195   : > { %p1005_p8 = pnand %p1004_p0, %p1637_p13 }
 0x196   : > { %p1010_p4 = por %p1009_p5, %p1008_p1 }
 0x197   : > { %p1006_p7 = pneg %p1005_p8 }
 0x198   : > { %p1012_p10 = por %p1011_p2, %p1010_p4 }
 0x19a   : > { %p1013_p9 = pnand %p1012_p10, %p1006_p7 }
 0x19c   : > { %1016 = shalt.err (!%p1013_p9)
}
 0x19d   : > { %s1147_s18 = smov 128   ;;  %s1148_s21 = smov 8  }
 0x19e   : > { %781 = dma.vmem_to_hbm [thread:$0]  (%p1637_p13), %s1503_s29, 2048, %s1501_s15, %s1513_s30, %s1147_s18, %s1147_s18, %s1148_s21  }
 0x19f PF: > { %s1638_s5 = sld [smem:[#allocation11_spill]]  ;;  %p795_p3 = scmp.ge.s32.totalorder %s1139_s25, 2 }
 0x1a0   : > { %p1639_p6 = scmp.ne.s32.totalorder %s1624_s22, 0 }
 0x1a2   : > { %p791_p11 = pnand %p795_p3, %p1639_p6 }
 0x1a5   : > { %s578_s28 = sand.u32 1, %s1638_s5  }
 0x1a6   : > { %s579_s0 = scalar_lea.sflag [#allocation4], %s578_s28 }
 0x1a7   : > { %1082 = dma.done.wait (!%p791_p11), %s579_s0, 2048  }
 0x1a8   : > { %1084 = vsyncadd (!%p791_p11), %s579_s0, 4294965248  ;;  %s22_s25 = sadd.s32 1, %s1139_s25   ;;  %s1641_s29 = sld [smem:[#allocation14_spill]] }
 0x1a9   : > { %p1542_p12 = scmp.ge.s32.totalorder %s22_s25, 6   ;;  %s1642_s30 = sld [smem:[#allocation15_spill]] }
 0x1aa   : > { %s1643_s12 = smov %s1091_s13  ;;  %s1644_s13 = smov %s1095_s14 }
 0x1ab   : > { %s1645_s14 = smov %s1270_s8  ;;  %s1646_s15 = smov %s1103_s16 }
 0x1ac   : > { %s1647_s16 = smov %s1107_s17  ;;  %s1648_s17 = smov %s1336_s6 }
 0x1ad   : > { %s1649_s18 = smov %s1115_s19  ;;  %s1650_s19 = smov %s1119_s20 }
 0x1ae   : > { %s1651_s20 = smov %s1273_s9  ;;  %s1652_s21 = smov %s1131_s23 }
 0x1af   : > { %s1653_s22 = smov %s1135_s24  ;;  %s1654_s23 = smov %s1641_s29 }
 0x1b0   : > { %s1655_s24 = smov %s1642_s30  ;;  %21 = sbr.rel (!%p1542_p12) target bundleno = 17 (0x11), region = 94 }
 0x1b7   :  { %584 = vsyncpa [#allocation3], 1 }
 0x1b8   :  { %586 = vsyncpa [#allocation3 + $0x1], 1 }
 0x1b9   :  { %587 = vsyncpa [#allocation6], 1 }
 0x1ba   :  { %589 = vsyncpa [#allocation6 + $0x1], 1 }
 0x1bb   :  { %590 = vsyncpa [#allocation4], 1 }
 0x1bc   :  { %592 = vsyncpa [#allocation4 + $0x1], 1 }

</bundles_post_ra>
